<compile_context>
chip_gen: v6e
topology: v6e:2x2x1
jax: 0.10.0
libtpu: 0.0.40
codegen_flags: <defaults>
</compile_context>

<pallas_src>
import jax
import jax.numpy as jnp
from jax import lax
from jax.experimental import pallas as pl
from jax.experimental.pallas import tpu as pltpu


_TABLE_TILE = 2048      # max fused-table rows resident per vocab (K) step
_MAX_BATCH_TILE = 512   # max batch rows per grid step


def _round_up(x, m):
    return (x + m - 1) // m * m


def _cdiv(a, b):
    return -(-a // b)


def init_attribute_encoder(cat_tbl, col_tbl, fab_tbl, store_tbl,
                           table_dtype=jnp.float32):
    """Build the fused, padded embedding table ONCE (module-init time, not per call).

    Returns (fused_tbl [V_pad, D], offsets [4], sizes [4]).
    """
    tables = (cat_tbl, col_tbl, fab_tbl, store_tbl)
    vocab_sizes = tuple(int(t.shape[0]) for t in tables)
    v_total = sum(vocab_sizes)
    # Pad so the K-tile size chosen in the wrapper always divides V_pad exactly.
    quantum = 128 if v_total <= _TABLE_TILE else _TABLE_TILE
    v_pad = _round_up(v_total, quantum)

    fused = jnp.concatenate([t.astype(table_dtype) for t in tables], axis=0)
    fused = jnp.pad(fused, ((0, v_pad - v_total), (0, 0)))

    offsets = jnp.array(
        [0,
         vocab_sizes[0],
         vocab_sizes[0] + vocab_sizes[1],
         vocab_sizes[0] + vocab_sizes[1] + vocab_sizes[2]],
        dtype=jnp.int32)
    sizes = jnp.array(vocab_sizes, dtype=jnp.int32)
    return fused, offsets, sizes


def _attr_encoder_kernel(idx_ref, tbl_ref, out_ref, acc_ref):
    """Grid (batch_tiles, vocab_tiles): multi-hot [tb, tk] @ table tile [tk, D]."""
    k = pl.program_id(1)

    @pl.when(k == 0)
    def _():
        acc_ref[...] = jnp.zeros_like(acc_ref)

    tb = idx_ref.shape[0]
    tk = tbl_ref.shape[0]

    idx = idx_ref[...]  # [tb, 4] int32, already offset into the fused vocab space
    iota = k * tk + lax.broadcasted_iota(jnp.int32, (tb, tk), 1)

    # The four vocab ranges are disjoint after offsetting, so OR == multi-hot sum.
    multihot = ((iota == idx[:, 0:1]) |
                (iota == idx[:, 1:2]) |
                (iota == idx[:, 2:3]) |
                (iota == idx[:, 3:4])).astype(tbl_ref.dtype)

    # One MXU push per K step accumulates the sum of the selected rows.
    acc_ref[...] += jnp.dot(multihot, tbl_ref[...],
                            preferred_element_type=jnp.float32)

    @pl.when(k == pl.num_programs(1) - 1)
    def _():
        out_ref[...] = acc_ref[...].astype(out_ref.dtype)


@jax.jit
def attribute_encoder(cat, col, fab, store, fused_tbl, offsets, sizes):
    """cat/col/fab/store: int [B]; fused_tbl: [V_pad, D]; returns float32 [B, D]."""
    B = cat.shape[0]
    v_pad, D = fused_tbl.shape

    # Clamp per-table (PyTorch would raise on OOB; clamping prevents silent
    # aliasing into a neighbouring table's vocab range), then offset and stack.
    idx = jnp.stack([cat, col, fab, store], axis=1).astype(jnp.int32)
    idx = jnp.clip(idx, 0, sizes[None, :] - 1) + offsets[None, :]

    # Batch tiling: >=2 parallel steps once B >= 16 (so both v7x TensorCores run)
    # and balanced tiles (avoid ~2x padding for B just above a multiple of 512).
    target_steps = max(2 if B >= 16 else 1, _cdiv(B, _MAX_BATCH_TILE))
    batch_tile = min(_round_up(B, 8), _round_up(_cdiv(B, target_steps), 8))
    b_pad = _round_up(B, batch_tile)
    if b_pad != B:
        idx = jnp.pad(idx, ((0, b_pad - B), (0, 0)))  # pad rows select row 0, sliced off

    # Vocab (K) tiling bounds VMEM to ~2*tk*D*itemsize for the table.
    tk = min(v_pad, _TABLE_TILE)
    num_k = v_pad // tk
    grid = (b_pad // batch_tile, num_k)

    # VMEM budget actually used (double-buffered inputs/outputs + scratch + LHS).
    d_pad = _round_up(D, 128)
    itm = fused_tbl.dtype.itemsize
    vmem_bytes = (2 * batch_tile * 128 * 4          # idx blocks (lane-padded)
                  + 2 * tk * d_pad * itm            # table blocks
                  + 2 * batch_tile * d_pad * 4      # output blocks
                  + batch_tile * d_pad * 4          # f32 accumulator scratch
                  + 4 * batch_tile * tk * 4)        # iota / multi-hot working set
    vmem_limit = int(min(64 << 20, max(2 * vmem_bytes + (1 << 20), 16 << 20)))

    cost = pl.CostEstimate(
        flops=2 * b_pad * v_pad * D,
        transcendentals=0,
        bytes_accessed=(b_pad // batch_tile) * v_pad * D * itm
                       + b_pad * (4 * 4 + D * 4))

    out = pl.pallas_call(
        _attr_encoder_kernel,
        out_shape=jax.ShapeDtypeStruct((b_pad, D), jnp.float32),
        grid=grid,
        in_specs=[
            pl.BlockSpec((batch_tile, 4), lambda i, k: (i, 0)),   # stacked indices
            pl.BlockSpec((tk, D), lambda i, k: (k, 0)),           # table K-tile
        ],
        out_specs=pl.BlockSpec((batch_tile, D), lambda i, k: (i, 0)),
        scratch_shapes=[pltpu.VMEM((batch_tile, D), jnp.float32)],
        compiler_params=pltpu.CompilerParams(
            dimension_semantics=("parallel", "arbitrary"),
            vmem_limit_bytes=vmem_limit),
        cost_estimate=cost,
    )(idx, fused_tbl)

    if b_pad != B:
        out = out[:B]
    return out


def _reference(cat, col, fab, store, cat_tbl, col_tbl, fab_tbl, store_tbl):
    return (jnp.take(cat_tbl, cat, axis=0)
            + jnp.take(col_tbl, col, axis=0)
            + jnp.take(fab_tbl, fab, axis=0)
            + jnp.take(store_tbl, store, axis=0))


def _run_case(key, num_cat, num_col, num_fab, num_store, embedding_dim, batch):
    k_cat, k_col, k_fab, k_store, k_i1, k_i2, k_i3, k_i4 = jax.random.split(key, 8)

    cat_tbl = jax.random.normal(k_cat, (num_cat, embedding_dim), dtype=jnp.float32)
    col_tbl = jax.random.normal(k_col, (num_col, embedding_dim), dtype=jnp.float32)
    fab_tbl = jax.random.normal(k_fab, (num_fab, embedding_dim), dtype=jnp.float32)
    store_tbl = jax.random.normal(k_store, (num_store, embedding_dim), dtype=jnp.float32)

    cat = jax.random.randint(k_i1, (batch,), 0, num_cat, dtype=jnp.int32)
    col = jax.random.randint(k_i2, (batch,), 0, num_col, dtype=jnp.int32)
    fab = jax.random.randint(k_i3, (batch,), 0, num_fab, dtype=jnp.int32)
    store = jax.random.randint(k_i4, (batch,), 0, num_store, dtype=jnp.int32)

    # "Module init": fused table built once, reused for every forward call.
    fused_tbl, offsets, sizes = init_attribute_encoder(cat_tbl, col_tbl, fab_tbl, store_tbl)

    out = attribute_encoder(cat, col, fab, store, fused_tbl, offsets, sizes)
    out = jax.block_until_ready(out)

    ref = _reference(cat, col, fab, store, cat_tbl, col_tbl, fab_tbl, store_tbl)
    assert out.shape == (batch, embedding_dim)
    assert jnp.allclose(out, ref, atol=1e-5, rtol=1e-5), "mismatch vs reference"


if __name__ == "__main__":
    key = jax.random.PRNGKey(0)
    k1, k2 = jax.random.split(key)

    # small case (grid collapses to a single batch tile, single vocab tile)
    _run_case(k1, num_cat=16, num_col=12, num_fab=10, num_store=20,
              embedding_dim=32, batch=8)

    # larger case exercising batch padding + 2 parallel batch tiles
    _run_case(k2, num_cat=300, num_col=200, num_fab=150, num_store=500,
              embedding_dim=32, batch=40)

    print("KERNEL_OK")
</pallas_src>

<mosaic_0001>
module attributes {stable_mosaic.version = 11 : i64} {
  func.func @_attr_encoder_kernel(%arg0: i32, %arg1: i32, %arg2: memref<8x4xi32, #tpu.memory_space<vmem>>, %arg3: memref<128x32xf32, #tpu.memory_space<vmem>>, %arg4: memref<8x32xf32, #tpu.memory_space<vmem>>, %arg5: memref<8x32xf32, #tpu.memory_space<vmem>>) attributes {dimension_semantics = [#tpu.dimension_semantics<parallel>, #tpu.dimension_semantics<arbitrary>], iteration_bounds = array<i64: 1, 1>, scalar_prefetch = 0 : i64, scratch_operands = 1 : i64, tpu.core_type = #tpu.core_type<tc>, window_params = [{transform_indices = @transform_0, window_bounds = array<i64: 8, 4>}, {transform_indices = @transform_1, window_bounds = array<i64: 128, 32>}, {transform_indices = @transform_2, window_bounds = array<i64: 8, 32>}]} {
    %c0_i32 = arith.constant 0 : i32
    %0 = arith.cmpi eq, %arg1, %c0_i32 : i32
    %1 = arith.extui %0 : i1 to i32
    %c0_i32_0 = arith.constant 0 : i32
    %2 = arith.cmpi ne, %1, %c0_i32_0 : i32
    scf.if %2 {
      %cst_10 = arith.constant 0.000000e+00 : f32
      %33 = vector.broadcast %cst_10 : f32 to vector<8x32xf32>
      %c0_11 = arith.constant 0 : index
      %c0_12 = arith.constant 0 : index
      %34 = vector.load %arg5[%c0_11, %c0_12] : memref<8x32xf32, #tpu.memory_space<vmem>>, vector<8x32xf32>
      tpu.vector_store %arg5[%c0_11, %c0_12], %33 {strides = array<i32>} : memref<8x32xf32, #tpu.memory_space<vmem>>, vector<8x32xf32>,
    } else {
    }
    %c0 = arith.constant 0 : index
    %c0_1 = arith.constant 0 : index
    %3 = vector.load %arg2[%c0, %c0_1] : memref<8x4xi32, #tpu.memory_space<vmem>>, vector<8x4xi32>
    %c128_i32 = arith.constant 128 : i32
    %4 = arith.muli %arg1, %c128_i32 : i32
    %5 = tpu.iota {dimensions = array<i32: 1>} : vector<8x128xi32>
    %6 = vector.broadcast %4 : i32 to vector<8x128xi32>
    %7 = arith.addi %6, %5 : vector<8x128xi32>
    %8 = vector.extract_strided_slice %3 {offsets = [0, 0], sizes = [8, 1], strides = [1, 1]} : vector<8x4xi32> to vector<8x1xi32>
    %9 = vector.broadcast %8 : vector<8x1xi32> to vector<8x128xi32>
    %10 = arith.cmpi eq, %7, %9 : vector<8x128xi32>
    %11 = vector.extract_strided_slice %3 {offsets = [0, 1], sizes = [8, 1], strides = [1, 1]} : vector<8x4xi32> to vector<8x1xi32>
    %12 = vector.broadcast %11 : vector<8x1xi32> to vector<8x128xi32>
    %13 = arith.cmpi eq, %7, %12 : vector<8x128xi32>
    %14 = arith.ori %10, %13 : vector<8x128xi1>
    %15 = vector.extract_strided_slice %3 {offsets = [0, 2], sizes = [8, 1], strides = [1, 1]} : vector<8x4xi32> to vector<8x1xi32>
    %16 = vector.broadcast %15 : vector<8x1xi32> to vector<8x128xi32>
    %17 = arith.cmpi eq, %7, %16 : vector<8x128xi32>
    %18 = arith.ori %14, %17 : vector<8x128xi1>
    %19 = vector.extract_strided_slice %3 {offsets = [0, 3], sizes = [8, 1], strides = [1, 1]} : vector<8x4xi32> to vector<8x1xi32>
    %20 = vector.broadcast %19 : vector<8x1xi32> to vector<8x128xi32>
    %21 = arith.cmpi eq, %7, %20 : vector<8x128xi32>
    %22 = arith.ori %18, %21 : vector<8x128xi1>
    %23 = arith.extui %22 : vector<8x128xi1> to vector<8x128xi32>
    %24 = arith.sitofp %23 : vector<8x128xi32> to vector<8x128xf32>
    %c0_2 = arith.constant 0 : index
    %c0_3 = arith.constant 0 : index
    %25 = vector.load %arg5[%c0_2, %c0_3] : memref<8x32xf32, #tpu.memory_space<vmem>>, vector<8x32xf32>
    %c0_4 = arith.constant 0 : index
    %c0_5 = arith.constant 0 : index
    %26 = vector.load %arg3[%c0_4, %c0_5] : memref<128x32xf32, #tpu.memory_space<vmem>>, vector<128x32xf32>
    %cst = arith.constant dense<0.000000e+00> : vector<8x32xf32>
    %27 = tpu.matmul %24, %26, %cst {dimension_numbers = #tpu.dot_dimension_numbers<[1], [0], [0], [1], [0, 0, 1, 1], [], []>} : vector<8x128xf32>, vector<128x32xf32>, vector<8x32xf32> -> vector<8x32xf32>
    %28 = arith.addf %25, %27 : vector<8x32xf32>
    %c0_6 = arith.constant 0 : index
    %c0_7 = arith.constant 0 : index
    %29 = vector.load %arg5[%c0_6, %c0_7] : memref<8x32xf32, #tpu.memory_space<vmem>>, vector<8x32xf32>
    tpu.vector_store %arg5[%c0_6, %c0_7], %28 {strides = array<i32>} : memref<8x32xf32, #tpu.memory_space<vmem>>, vector<8x32xf32>,
    %c0_i32_8 = arith.constant 0 : i32
    %30 = arith.cmpi eq, %arg1, %c0_i32_8 : i32
    %31 = arith.extui %30 : i1 to i32
    %c0_i32_9 = arith.constant 0 : i32
    %32 = arith.cmpi ne, %31, %c0_i32_9 : i32
    scf.if %32 {
      %c0_10 = arith.constant 0 : index
      %c0_11 = arith.constant 0 : index
      %33 = vector.load %arg5[%c0_10, %c0_11] : memref<8x32xf32, #tpu.memory_space<vmem>>, vector<8x32xf32>
      %c0_12 = arith.constant 0 : index
      %c0_13 = arith.constant 0 : index
      %34 = vector.load %arg4[%c0_12, %c0_13] : memref<8x32xf32, #tpu.memory_space<vmem>>, vector<8x32xf32>
      tpu.vector_store %arg4[%c0_12, %c0_13], %33 {strides = array<i32>} : memref<8x32xf32, #tpu.memory_space<vmem>>, vector<8x32xf32>,
    } else {
    }
    return
  }
  func.func @transform_0(%arg0: i32, %arg1: i32) -> (i32, i32) {
    %c0_i32 = arith.constant 0 : i32
    %c0_i32_0 = arith.constant 0 : i32
    return %arg0, %c0_i32 : i32, i32
  }
  func.func @transform_1(%arg0: i32, %arg1: i32) -> (i32, i32) {
    %c0_i32 = arith.constant 0 : i32
    %c0_i32_0 = arith.constant 0 : i32
    return %arg1, %c0_i32 : i32, i32
  }
  func.func @transform_2(%arg0: i32, %arg1: i32) -> (i32, i32) {
    %c0_i32 = arith.constant 0 : i32
    %c0_i32_0 = arith.constant 0 : i32
    return %arg0, %c0_i32 : i32, i32
  }
}

</mosaic_0001>

<bundles_post_ra>
// kernel: attribute_encoder.1
= control target key start
LH: loop header
LB: loop body
LE: loop exit
PB: predicated region body
PF: predicated region fallthrough
CT: control target
= control target key end

     0   :  { %v243_v1 = vmov 0   ;;  %v244_v2 = vmov 2   ;;  %v245_v4 = vmov 0.0   ;;  %v246_v6 = vmov 1   ;;  %s323_s0 = inlined_call_operand.vmem [shape: s32[8,4], index: 0, kind: input, shape index: {}]   ;;  %s324_s1 = inlined_call_operand.vmem [shape: f32[128,32], index: 1, kind: input, shape index: {}]   ;;  %s325_s2 = inlined_call_operand.hbm [shape: f32[8,32], index: 2, kind: output, shape index: {}]  }
   0x1   :  { %v18_v0 = vld [vmem:[%s323_s0] sm:$0xff]  ;;  %216 = vset.pattern.permute.xlu0 %v243_v1  ;;  %218 = vset.pattern.permute.xlu1 %v244_v2  ;;  %v61_v3 = vld [vmem:[%s324_s1 + $0x78] sm:$0xff]  ;;  %v60_v5 = vld [vmem:[%s324_s1 + $0x70] sm:$0xff]  ;;  %v247_v7 = vmov 3  }
   0x2   :  { %25 = vperm.xlu0 %216, %v18_v0   ;;  %34 = vperm.xlu1 %218, %v18_v0  }
   0x3   :  { %173 = vmatprep.subr.mxu0 %v245_v4 }
   0x4   :  { %174 = vmatpush3.msra.mxu0 %v61_v3 }
   0x5   :  { %175 = vmatprep.subr.mxu0 %v245_v4 }
   0x6   :  { %217 = vset.pattern.permute.xlu0 %v246_v6  ;;  %219 = vset.pattern.permute.xlu1 %v247_v7 }
   0x7   :  { %7 = vsyncpa [#allocation4], 0  ;;  %29 = vperm.xlu0 %217, %v18_v0   ;;  %39 = vperm.xlu1 %219, %v18_v0   ;;  %v59_v8 = vld [vmem:[%s324_s1 + $0x68] sm:$0xff]  ;;  %vm16_vm0 = vcmask 261120   ;;  %vm248_vm1 = vmmov 0   ;;  %v58_v9 = vld [vmem:[%s324_s1 + $0x60] sm:$0xff]  ;;  %v20_v22 = vlaneseq }
   0x8   :  { %176 = vmatpush3.msra.mxu0 %v60_v5  ;;  %205 = vmatprep.mubr.msk.f32.mxu0 %vm248_vm1, %v245_v4  ;;  %17 = vst.msk [vmem:[#allocation2] sm:$0xff] %vm16_vm0, %v245_v4  ;;  %v57_v10 = vld [vmem:[%s324_s1 + $0x58] sm:$0xff]  ;;  %v56_v11 = vld [vmem:[%s324_s1 + $0x50] sm:$0xff]  ;;  %v55_v12 = vld [vmem:[%s324_s1 + $0x48] sm:$0xff]  ;;  %v249_v28 = vmov 1.0  }
   0x9   :  { %177 = vmatprep.subr.mxu0 %v245_v4  ;;  %v54_v13 = vld [vmem:[%s324_s1 + $0x40] sm:$0xff]  ;;  %v53_v14 = vld [vmem:[%s324_s1 + $0x38] sm:$0xff]  ;;  %v52_v15 = vld [vmem:[%s324_s1 + $0x30] sm:$0xff]  ;;  %v21_v25 = vand.u32 127, %v20_v22 }
   0xa   :  { %178 = vmatpush3.msra.mxu0 %v59_v8  ;;  %v51_v16 = vld [vmem:[%s324_s1 + $0x28] sm:$0xff]  ;;  %v50_v17 = vld [vmem:[%s324_s1 + $0x20] sm:$0xff]  ;;  %v49_v18 = vld [vmem:[%s324_s1 + $0x18] sm:$0xff] }
   0xb   :  { %179 = vmatprep.subr.mxu0 %v245_v4  ;;  %220 = vset.pattern.permute.xlu0 %v247_v7  ;;  %v48_v19 = vld [vmem:[%s324_s1 + $0x10] sm:$0xff]  ;;  %v47_v20 = vld [vmem:[%s324_s1 + $0x8] sm:$0xff]  ;;  %v46_v21 = vld [vmem:[%s324_s1] sm:$0xff]  ;;  %s250_s1 = smov [#allocation3]  }
   0xc   :  { %180 = vmatpush3.msra.mxu0 %v58_v9  ;;  %s146_s14 = sshll.u32 %s250_s1, 4  ;;  %s147_s14 = int_to_ptr.vmem [resolvable:$true] %s146_s14 }
   0xd   :  { %181 = vmatprep.subr.mxu0 %v245_v4  ;;  %s221_s0 = scalar_lea.vmem %s147_s14, 128  ;;  %p226_p1 = scmp.lt.s32.totalorder %s147_s14, %s147_s14 }
   0xe   :  { %182 = vmatpush3.msra.mxu0 %v57_v10  ;;  %p222_p0 = scmp.ne.s32.totalorder %s147_s14, %s221_s0  ;;  %p227_p2 = scmp.lt.s32.totalorder %s221_s0, %s221_s0 }
   0xf   :  { %183 = vmatprep.subr.mxu0 %v245_v4  ;;  %v45_v29 = vld [vmem:[#allocation2] sm:$0xff] }
  0x10   :  { %184 = vmatpush3.msra.mxu0 %v56_v11  ;;  %p228_p3 = por %p227_p2, %p226_p1 }
  0x11   :  { %185 = vmatprep.subr.mxu0 %v245_v4 }
  0x12   :  { %186 = vmatpush3.msra.mxu0 %v55_v12  ;;  %p229_p4 = pnand %p228_p3, %p222_p0 }
  0x13   :  { %187 = vmatprep.subr.mxu0 %v245_v4 }
  0x14   :  { %188 = vmatpush3.msra.mxu0 %v54_v13 }
  0x15   :  { %189 = vmatprep.subr.mxu0 %v245_v4 }
  0x16   :  { %190 = vmatpush3.msra.mxu0 %v53_v14 }
  0x17   :  { %191 = vmatprep.subr.mxu0 %v245_v4 }
  0x18   :  { %192 = vmatpush3.msra.mxu0 %v52_v15 }
  0x19   :  { %193 = vmatprep.subr.mxu0 %v245_v4 }
  0x1a   :  { %194 = vmatpush3.msra.mxu0 %v51_v16 }
  0x1b   :  { %195 = vmatprep.subr.mxu0 %v245_v4 }
  0x1c   :  { %196 = vmatpush3.msra.mxu0 %v50_v17 }
  0x1d   :  { %197 = vmatprep.subr.mxu0 %v245_v4 }
  0x1e   :  { %198 = vmatpush3.msra.mxu0 %v49_v18 }
  0x1f   :  { %199 = vmatprep.subr.mxu0 %v245_v4 }
  0x20   :  { %200 = vmatpush3.msra.mxu0 %v48_v19 }
  0x21   :  { %201 = vmatprep.subr.mxu0 %v245_v4 }
  0x22   :  { %202 = vmatpush3.msra.mxu0 %v47_v20 }
  0x23   :  { %203 = vmatprep.subr.mxu0 %v245_v4 }
  0x24   :  { %204 = vmatpush3.msra.mxu0 %v46_v21 }
  0x7d   :  { %v26_v23 = vpop.permute.xlu0 %25  ;;  %v35_v24 = vpop.permute.xlu1 %34 }
  0x7e   :  { %vm27_vm2 = vcmp.eq.s32.totalorder %v21_v25, %v26_v23  ;;  %vm36_vm5 = vcmp.eq.s32.totalorder %v21_v25, %v35_v24 }
  0x82   :  { %v30_v26 = vpop.permute.xlu0 %29  ;;  %v40_v27 = vpop.permute.xlu1 %39 }
  0x83   :  { %vm31_vm3 = vcmp.eq.s32.totalorder %v21_v25, %v30_v26  ;;  %vm41_vm4 = vcmp.eq.s32.totalorder %v21_v25, %v40_v27 }
  0x84   :  { %vm32_vm6 = vmor %vm27_vm2, %vm31_vm3 }
  0x85   :  { %vm37_vm7 = vmor %vm32_vm6, %vm36_vm5 }
  0x86   :  { %vm42_vm8 = vmor %vm37_vm7, %vm41_vm4 }
  0x87   :  { %206 = vmatmul.mubr.msk.f32.vlgmr.msra.gmra.mxu0 %vm42_vm8, %v249_v28 }
 0x147   :  { %v128_v30 = vpop.f32.mrf.mxu0 }
 0x148   :  { %v132_v31 = vadd.f32 %v128_v30, %v45_v29 }
 0x149   :  { %v207_v32 = vpop.f32.mrf.mxu0 }
 0x14a   :  { %134 = vst.msk [vmem:[#allocation2] sm:$0xff] %vm16_vm0, %v132_v31 }
 0x151   :  { %v138_v33 = vld [vmem:[#allocation2] sm:$0xff] }
 0x152   :  { %139 = vst.msk [vmem:[#allocation3] sm:$0xff] %vm16_vm0, %v138_v33 }
 0x153   :  { %232 = shalt.err (!%p229_p4)
}
 0x154   :  { %149 = dma.vmem_to_hbm [thread:$0]  %s147_s14, 128, %s325_s2, [#allocation4]  }
 0x155   :  { %241 = dma.done.wait [#allocation4], 128  }
 0x156   :  { %242 = vsyncadd [#allocation4], 4294967168 }
 0x157   :  { %153 = vsyncpa [#allocation4], 1 }

</bundles_post_ra>
